<compile_context>
chip_gen: v7x
topology: tpu7x:2x2x1
jax: 0.10.0
libtpu: 0.0.40
codegen_flags: <defaults>
</compile_context>

<pallas_src>
import jax
import jax.numpy as jnp
from jax.experimental import pallas as pl
from jax.experimental.pallas import tpu as pltpu

_LANES = 128
_SINGLE_BLOCK_BYTES = 1 << 20   # <= 1 MiB: one whole-array block, grid=(1,)
_TARGET_TILE_BYTES = 1 << 20    # ~1 MiB lane-dense blocks for large arrays


def _copy_kernel(a_ref, o_ref):
    # forward() of vector_var returns the parameter A -> identity copy.
    o_ref[...] = a_ref[...]


def _choose_tile_rows(rows: int, itemsize: int) -> int:
    """Pick sublane tile size (static, trace-time Python)."""
    total_bytes = rows * _LANES * itemsize
    if total_bytes <= _SINGLE_BLOCK_BYTES:
        # Tiny/small arrays: one whole-array block; per-step overhead would
        # dominate any finer tiling and there is nothing to double-buffer.
        return rows
    # Large arrays: ~1 MiB blocks (e.g. 2048 rows for f32), multiple of 8
    # sublanes so the (8, 128) block constraint is satisfied.
    tile_rows = max(8, (_TARGET_TILE_BYTES // (_LANES * itemsize)) // 8 * 8)
    return min(tile_rows, rows)


@jax.jit
def vector_var_forward(A):
    """Pallas equivalent of vector_var.forward(): returns the parameter A."""
    orig_shape = A.shape
    n = A.size
    itemsize = jnp.dtype(A.dtype).itemsize

    # Flatten to a lane-dense (rows, 128) slab; pad the flat vector so the
    # last dim is exactly 128 lanes (unmasked full-lane vld/vst).
    rows = pl.cdiv(n, _LANES)
    flat = A.reshape(-1)
    if rows * _LANES != n:
        flat = jnp.pad(flat, (0, rows * _LANES - n))

    tile_rows = _choose_tile_rows(rows, itemsize)

    # Pad rows so tile_rows divides exactly (at most one extra block of
    # traffic); avoids the old whole-array fallback that could blow VMEM.
    padded_rows = pl.cdiv(rows, tile_rows) * tile_rows
    if padded_rows != rows:
        flat = jnp.pad(flat, (0, (padded_rows - rows) * _LANES))

    a2d = flat.reshape(padded_rows, _LANES)
    grid = (padded_rows // tile_rows,)

    out2d = pl.pallas_call(
        _copy_kernel,
        out_shape=jax.ShapeDtypeStruct((padded_rows, _LANES), A.dtype),
        grid=grid,
        in_specs=[pl.BlockSpec((tile_rows, _LANES), lambda i: (i, 0))],
        out_specs=pl.BlockSpec((tile_rows, _LANES), lambda i: (i, 0)),
        compiler_params=pltpu.CompilerParams(
            dimension_semantics=("parallel",),
        ),
        cost_estimate=pl.CostEstimate(
            flops=0,
            transcendentals=0,
            bytes_accessed=2 * n * itemsize,
        ),
    )(a2d)

    return out2d.reshape(-1)[:n].reshape(orig_shape)


if __name__ == "__main__":
    # Module __init__: A = torch.rand(set_size, 1, size, size) -> uniform [0, 1).
    set_size, size = 8, 16
    key = jax.random.PRNGKey(0)
    A = jax.random.uniform(key, (set_size, 1, size, size), dtype=jnp.float32)

    out = jax.block_until_ready(vector_var_forward(A))

    assert out.shape == (set_size, 1, size, size)
    assert out.dtype == jnp.float32
    assert bool(jnp.array_equal(out, A))
    print("KERNEL_OK")
</pallas_src>

<mosaic_0001>
module attributes {stable_mosaic.version = 11 : i64} {
  func.func @_copy_kernel(%arg0: i32, %arg1: memref<16x128xf32, #tpu.memory_space<vmem>>, %arg2: memref<16x128xf32, #tpu.memory_space<vmem>>) attributes {dimension_semantics = [#tpu.dimension_semantics<parallel>], iteration_bounds = array<i64: 1>, scalar_prefetch = 0 : i64, scratch_operands = 0 : i64, tpu.core_type = #tpu.core_type<tc>, window_params = [{transform_indices = @transform_0, window_bounds = array<i64: 16, 128>}, {transform_indices = @transform_1, window_bounds = array<i64: 16, 128>}]} {
    %c0 = arith.constant 0 : index
    %c0_0 = arith.constant 0 : index
    %0 = vector.load %arg1[%c0, %c0_0] : memref<16x128xf32, #tpu.memory_space<vmem>>, vector<16x128xf32>
    %c0_1 = arith.constant 0 : index
    %c0_2 = arith.constant 0 : index
    %1 = vector.load %arg2[%c0_1, %c0_2] : memref<16x128xf32, #tpu.memory_space<vmem>>, vector<16x128xf32>
    tpu.vector_store %arg2[%c0_1, %c0_2], %0 {strides = array<i32>} : memref<16x128xf32, #tpu.memory_space<vmem>>, vector<16x128xf32>,
    return
  }
  func.func @transform_0(%arg0: i32) -> (i32, i32) {
    %c0_i32 = arith.constant 0 : i32
    %c0_i32_0 = arith.constant 0 : i32
    return %arg0, %c0_i32 : i32, i32
  }
  func.func @transform_1(%arg0: i32) -> (i32, i32) {
    %c0_i32 = arith.constant 0 : i32
    %c0_i32_0 = arith.constant 0 : i32
    return %arg0, %c0_i32 : i32, i32
  }
}

</mosaic_0001>

<bundles_post_ra>
// kernel: vector_var_forward.1
= control target key start
LH: loop header
LB: loop body
LE: loop exit
PB: predicated region body
PF: predicated region fallthrough
CT: control target
= control target key end

     0   :  { %s38_s0 = inlined_call_operand.vmem [shape: f32[16,128], index: 0, kind: input, shape index: {}]   ;;  %s39_s1 = inlined_call_operand.vmem [shape: f32[16,128], index: 1, kind: output, shape index: {}]  }
   0x1   :  { %v8_v0 = vld [vmem:[%s38_s0] sm:$0xff]  ;;  %v9_v1 = vld [vmem:[%s38_s0 + $0x8] sm:$0xff] }
   0x2   :  { %10 = vst [vmem:[%s39_s1] sm:$0xff] %v8_v0  ;;  %11 = vst [vmem:[%s39_s1 + $0x8] sm:$0xff] %v9_v1 }

</bundles_post_ra>
